<compile_context>
chip_gen: v6e
topology: v6e:2x2x1
jax: 0.10.0
libtpu: 0.0.40
codegen_flags: <defaults>
</compile_context>

<pallas_src>
import jax
import jax.numpy as jnp
from jax.experimental import pallas as pl
from jax.experimental.pallas import tpu as pltpu


def critic_kernel(s_ref, a_ref, w1s_ref, w1a_ref, b1_ref, w2_ref, b2_ref,
                  w3_ref, b3_ref, o_ref):
    # s_ref : [TB, S]    a_ref : [TB, A]
    # w1s   : [S, H]     w1a   : [A, H]     b1 : [1, H]
    # w2    : [H, H]     b2    : [1, H]
    # w3    : [1, H]     b3    : [1, 1]  (SMEM scalar)
    # o_ref : [TB, 1]
    h1 = jnp.dot(s_ref[...], w1s_ref[...], preferred_element_type=jnp.float32)
    h1 = h1 + jnp.dot(a_ref[...], w1a_ref[...], preferred_element_type=jnp.float32)
    h1 = jnp.maximum(h1 + b1_ref[...], 0.0)

    h2 = jnp.dot(h1, w2_ref[...], preferred_element_type=jnp.float32) + b2_ref[...]
    h2 = jnp.maximum(h2, 0.0)

    # Final H->1 layer off the MXU: lane-wise multiply + cross-lane reduce
    # (VPU + XLU slots, which are otherwise idle), plus a scalar SMEM bias.
    out = jnp.sum(h2 * w3_ref[...], axis=-1, keepdims=True) + b3_ref[0, 0]
    o_ref[...] = out.astype(o_ref.dtype)


def critic_forward(state, action, params, *, max_tile_b=512):
    """Fused Critic forward pass via one batch-tiled Pallas kernel.

    state:  [B, state_dim]   float32
    action: [B, action_dim]  float32
    returns [B, 1]           float32
    """
    w1s, w1a, b1, w2, b2, w3, b3 = params
    B, state_dim = state.shape
    action_dim = action.shape[1]
    H = w1s.shape[1]
    obs = state_dim + action_dim

    # Batch tiling: full batch if small (legal block = full dim), else fixed
    # 512-row tiles (multiple of 8) with zero-padding of the ragged remainder.
    if B <= max_tile_b:
        tile_b, b_pad = B, B
    else:
        tile_b = max_tile_b
        b_pad = ((B + tile_b - 1) // tile_b) * tile_b
    if b_pad != B:
        pad = b_pad - B
        state = jnp.pad(state, ((0, pad), (0, 0)))
        action = jnp.pad(action, ((0, pad), (0, 0)))
    grid = (b_pad // tile_b,)

    f32 = 4
    weight_bytes = (w1s.size + w1a.size + b1.size + w2.size + b2.size + w3.size) * f32
    io_bytes = 2 * tile_b * (obs + 1) * f32           # double-buffered in/out tiles
    vmem_limit = int(min(64 << 20, max(8 << 20, 4 * (weight_bytes + io_bytes) + (4 << 20))))

    cost = pl.CostEstimate(
        flops=2 * b_pad * (obs * H + H * H + H),
        transcendentals=0,
        bytes_accessed=(state.size + action.size + b_pad) * f32 + weight_bytes + b3.size * f32,
    )

    batch_spec = lambda cols: pl.BlockSpec((tile_b, cols), lambda i: (i, 0))
    resident = lambda shape: pl.BlockSpec(shape, lambda i: (0, 0))

    out = pl.pallas_call(
        critic_kernel,
        out_shape=jax.ShapeDtypeStruct((b_pad, 1), jnp.float32),
        grid=grid,
        in_specs=[
            batch_spec(state_dim),                                   # state tile
            batch_spec(action_dim),                                  # action tile
            resident((state_dim, H)),                                # W1 (state half)
            resident((action_dim, H)),                               # W1 (action half)
            resident((1, H)),                                        # b1
            resident((H, H)),                                        # W2
            resident((1, H)),                                        # b2
            resident((1, H)),                                        # w3 row
            pl.BlockSpec(memory_space=pltpu.MemorySpace.SMEM),       # b3 scalar
        ],
        out_specs=batch_spec(1),
        compiler_params=pltpu.CompilerParams(
            dimension_semantics=("parallel",),
            vmem_limit_bytes=vmem_limit,
        ),
        cost_estimate=cost,
    )(state, action, w1s, w1a, b1, w2, b2, w3, b3)

    return out[:B] if b_pad != B else out


def init_critic_params(key, state_dim, action_dim, hidden_size):
    """Deterministic init mirroring nn.Linear defaults (U[-1/sqrt(fan_in), +]).

    W1 is generated at full [obs, H] and split into state/action halves so the
    kernel can skip the concat; w3 is kept as a [1, H] row (torch layout)."""
    obs = state_dim + action_dim

    def linear(k, fan_in, fan_out):
        kw, kb = jax.random.split(k)
        bound = 1.0 / jnp.sqrt(float(fan_in))
        w = jax.random.uniform(kw, (fan_in, fan_out), jnp.float32, -bound, bound)
        b = jax.random.uniform(kb, (1, fan_out), jnp.float32, -bound, bound)
        return w, b

    k1, k2, k3 = jax.random.split(key, 3)
    w1, b1 = linear(k1, obs, hidden_size)
    w2, b2 = linear(k2, hidden_size, hidden_size)
    w3_col, b3 = linear(k3, hidden_size, 1)            # [H, 1], [1, 1]
    w1s, w1a = w1[:state_dim], w1[state_dim:]
    w3 = w3_col.T                                      # [1, H] row for lane reduce
    return (w1s, w1a, b1, w2, b2, w3, b3)


def critic_reference(state, action, params):
    """Pure-JAX reference (equivalent to the PyTorch module)."""
    w1s, w1a, b1, w2, b2, w3, b3 = params
    x = jnp.concatenate([state, action], axis=-1)
    w1 = jnp.concatenate([w1s, w1a], axis=0)
    h1 = jnp.maximum(x @ w1 + b1, 0.0)
    h2 = jnp.maximum(h1 @ w2 + b2, 0.0)
    return h2 @ w3.T + b3


if __name__ == "__main__":
    # Small shapes consistent with the module: obs_size = state_dim + action_dim.
    batch = 8
    state_dim = 24
    action_dim = 8
    hidden_size = 32

    key = jax.random.PRNGKey(0)
    k_s, k_a, k_p = jax.random.split(key, 3)
    params = init_critic_params(k_p, state_dim, action_dim, hidden_size)

    # --- small batch (single grid step) -------------------------------------
    state = jax.random.normal(k_s, (batch, state_dim), dtype=jnp.float32)
    action = jax.random.normal(k_a, (batch, action_dim), dtype=jnp.float32)
    out = jax.block_until_ready(critic_forward(state, action, params))
    ref = critic_reference(state, action, params)
    assert out.shape == (batch, 1), out.shape
    assert jnp.allclose(out, ref, atol=1e-5, rtol=1e-5), (
        f"max abs err = {jnp.max(jnp.abs(out - ref))}"
    )

    # --- larger batch (multi-tile grid + ragged padding path) ----------------
    big_b = 1040
    k_s2, k_a2 = jax.random.split(jax.random.PRNGKey(1))
    state2 = jax.random.normal(k_s2, (big_b, state_dim), dtype=jnp.float32)
    action2 = jax.random.normal(k_a2, (big_b, action_dim), dtype=jnp.float32)
    out2 = jax.block_until_ready(critic_forward(state2, action2, params))
    ref2 = critic_reference(state2, action2, params)
    assert out2.shape == (big_b, 1), out2.shape
    assert jnp.allclose(out2, ref2, atol=1e-5, rtol=1e-5), (
        f"max abs err = {jnp.max(jnp.abs(out2 - ref2))}"
    )

    print("KERNEL_OK")
</pallas_src>

<mosaic_0001>
module attributes {stable_mosaic.version = 11 : i64} {
  func.func @critic_kernel(%arg0: i32, %arg1: memref<8x24xf32, #tpu.memory_space<vmem>>, %arg2: memref<8x8xf32, #tpu.memory_space<vmem>>, %arg3: memref<24x32xf32, #tpu.memory_space<vmem>>, %arg4: memref<8x32xf32, #tpu.memory_space<vmem>>, %arg5: memref<1x32xf32, #tpu.memory_space<vmem>>, %arg6: memref<32x32xf32, #tpu.memory_space<vmem>>, %arg7: memref<1x32xf32, #tpu.memory_space<vmem>>, %arg8: memref<1x32xf32, #tpu.memory_space<vmem>>, %arg9: memref<1x1xf32, #tpu.memory_space<smem>>, %arg10: memref<8x1xf32, #tpu.memory_space<vmem>>) attributes {dimension_semantics = [#tpu.dimension_semantics<parallel>], iteration_bounds = array<i64: 1>, scalar_prefetch = 0 : i64, scratch_operands = 0 : i64, tpu.core_type = #tpu.core_type<tc>, window_params = [{transform_indices = @transform_0, window_bounds = array<i64: 8, 24>}, {transform_indices = @transform_1, window_bounds = array<i64: 8, 8>}, {pipeline_mode = #tpu.pipeline_mode<synchronous>, transform_indices = @transform_2, window_bounds = array<i64: 24, 32>}, {pipeline_mode = #tpu.pipeline_mode<synchronous>, transform_indices = @transform_3, window_bounds = array<i64: 8, 32>}, {pipeline_mode = #tpu.pipeline_mode<synchronous>, transform_indices = @transform_4, window_bounds = array<i64: 1, 32>}, {pipeline_mode = #tpu.pipeline_mode<synchronous>, transform_indices = @transform_5, window_bounds = array<i64: 32, 32>}, {pipeline_mode = #tpu.pipeline_mode<synchronous>, transform_indices = @transform_6, window_bounds = array<i64: 1, 32>}, {pipeline_mode = #tpu.pipeline_mode<synchronous>, transform_indices = @transform_7, window_bounds = array<i64: 1, 32>}, {transform_indices = @transform_8, window_bounds = array<i64: 1, 1>}, {transform_indices = @transform_9, window_bounds = array<i64: 8, 1>}]} {
    %c0 = arith.constant 0 : index
    %c0_0 = arith.constant 0 : index
    %0 = vector.load %arg1[%c0, %c0_0] : memref<8x24xf32, #tpu.memory_space<vmem>>, vector<8x24xf32>
    %c0_1 = arith.constant 0 : index
    %c0_2 = arith.constant 0 : index
    %1 = vector.load %arg3[%c0_1, %c0_2] : memref<24x32xf32, #tpu.memory_space<vmem>>, vector<24x32xf32>
    %cst = arith.constant dense<0.000000e+00> : vector<8x32xf32>
    %2 = tpu.matmul %0, %1, %cst {dimension_numbers = #tpu.dot_dimension_numbers<[1], [0], [0], [1], [0, 0, 1, 1], [], []>} : vector<8x24xf32>, vector<24x32xf32>, vector<8x32xf32> -> vector<8x32xf32>
    %c0_3 = arith.constant 0 : index
    %c0_4 = arith.constant 0 : index
    %3 = vector.load %arg2[%c0_3, %c0_4] : memref<8x8xf32, #tpu.memory_space<vmem>>, vector<8x8xf32>
    %c0_5 = arith.constant 0 : index
    %c0_6 = arith.constant 0 : index
    %4 = vector.load %arg4[%c0_5, %c0_6] : memref<8x32xf32, #tpu.memory_space<vmem>>, vector<8x32xf32>
    %cst_7 = arith.constant dense<0.000000e+00> : vector<8x32xf32>
    %5 = tpu.matmul %3, %4, %cst_7 {dimension_numbers = #tpu.dot_dimension_numbers<[1], [0], [0], [1], [0, 0, 1, 1], [], []>} : vector<8x8xf32>, vector<8x32xf32>, vector<8x32xf32> -> vector<8x32xf32>
    %6 = arith.addf %2, %5 : vector<8x32xf32>
    %c0_8 = arith.constant 0 : index
    %c0_9 = arith.constant 0 : index
    %7 = vector.load %arg5[%c0_8, %c0_9] : memref<1x32xf32, #tpu.memory_space<vmem>>, vector<1x32xf32>
    %8 = vector.broadcast %7 : vector<1x32xf32> to vector<8x32xf32>
    %9 = arith.addf %6, %8 : vector<8x32xf32>
    %cst_10 = arith.constant 0.000000e+00 : f32
    %10 = vector.broadcast %cst_10 : f32 to vector<8x32xf32>
    %11 = arith.maximumf %9, %10 : vector<8x32xf32>
    %c0_11 = arith.constant 0 : index
    %c0_12 = arith.constant 0 : index
    %12 = vector.load %arg6[%c0_11, %c0_12] : memref<32x32xf32, #tpu.memory_space<vmem>>, vector<32x32xf32>
    %cst_13 = arith.constant dense<0.000000e+00> : vector<8x32xf32>
    %13 = tpu.matmul %11, %12, %cst_13 {dimension_numbers = #tpu.dot_dimension_numbers<[1], [0], [0], [1], [0, 0, 1, 1], [], []>} : vector<8x32xf32>, vector<32x32xf32>, vector<8x32xf32> -> vector<8x32xf32>
    %c0_14 = arith.constant 0 : index
    %c0_15 = arith.constant 0 : index
    %14 = vector.load %arg7[%c0_14, %c0_15] : memref<1x32xf32, #tpu.memory_space<vmem>>, vector<1x32xf32>
    %15 = vector.broadcast %14 : vector<1x32xf32> to vector<8x32xf32>
    %16 = arith.addf %13, %15 : vector<8x32xf32>
    %cst_16 = arith.constant 0.000000e+00 : f32
    %17 = vector.broadcast %cst_16 : f32 to vector<8x32xf32>
    %18 = arith.maximumf %16, %17 : vector<8x32xf32>
    %c0_17 = arith.constant 0 : index
    %c0_18 = arith.constant 0 : index
    %19 = vector.load %arg8[%c0_17, %c0_18] : memref<1x32xf32, #tpu.memory_space<vmem>>, vector<1x32xf32>
    %20 = vector.broadcast %19 : vector<1x32xf32> to vector<8x32xf32>
    %21 = arith.mulf %18, %20 : vector<8x32xf32>
    %cst_19 = arith.constant dense<0.000000e+00> : vector<8xf32>
    %22 = vector.multi_reduction <add>, %21, %cst_19 [1] : vector<8x32xf32> to vector<8xf32>
    %23 = vector.shape_cast %22 : vector<8xf32> to vector<8x1xf32>
    %c0_20 = arith.constant 0 : index
    %c0_21 = arith.constant 0 : index
    %24 = memref.load %arg9[%c0_20, %c0_21] : memref<1x1xf32, #tpu.memory_space<smem>>
    %25 = vector.broadcast %24 : f32 to vector<8x1xf32>
    %26 = arith.addf %23, %25 : vector<8x1xf32>
    %c0_22 = arith.constant 0 : index
    %c0_23 = arith.constant 0 : index
    %27 = vector.load %arg10[%c0_22, %c0_23] : memref<8x1xf32, #tpu.memory_space<vmem>>, vector<8x1xf32>
    tpu.vector_store %arg10[%c0_22, %c0_23], %26 {strides = array<i32>} : memref<8x1xf32, #tpu.memory_space<vmem>>, vector<8x1xf32>,
    return
  }
  func.func @transform_0(%arg0: i32) -> (i32, i32) {
    %c0_i32 = arith.constant 0 : i32
    %c0_i32_0 = arith.constant 0 : i32
    return %arg0, %c0_i32 : i32, i32
  }
  func.func @transform_1(%arg0: i32) -> (i32, i32) {
    %c0_i32 = arith.constant 0 : i32
    %c0_i32_0 = arith.constant 0 : i32
    return %arg0, %c0_i32 : i32, i32
  }
  func.func @transform_2(%arg0: i32) -> (i32, i32) {
    %c0_i32 = arith.constant 0 : i32
    %c0_i32_0 = arith.constant 0 : i32
    %c0_i32_1 = arith.constant 0 : i32
    return %c0_i32, %c0_i32_0 : i32, i32
  }
  func.func @transform_3(%arg0: i32) -> (i32, i32) {
    %c0_i32 = arith.constant 0 : i32
    %c0_i32_0 = arith.constant 0 : i32
    %c0_i32_1 = arith.constant 0 : i32
    return %c0_i32, %c0_i32_0 : i32, i32
  }
  func.func @transform_4(%arg0: i32) -> (i32, i32) {
    %c0_i32 = arith.constant 0 : i32
    %c0_i32_0 = arith.constant 0 : i32
    %c0_i32_1 = arith.constant 0 : i32
    return %c0_i32, %c0_i32_0 : i32, i32
  }
  func.func @transform_5(%arg0: i32) -> (i32, i32) {
    %c0_i32 = arith.constant 0 : i32
    %c0_i32_0 = arith.constant 0 : i32
    %c0_i32_1 = arith.constant 0 : i32
    return %c0_i32, %c0_i32_0 : i32, i32
  }
  func.func @transform_6(%arg0: i32) -> (i32, i32) {
    %c0_i32 = arith.constant 0 : i32
    %c0_i32_0 = arith.constant 0 : i32
    %c0_i32_1 = arith.constant 0 : i32
    return %c0_i32, %c0_i32_0 : i32, i32
  }
  func.func @transform_7(%arg0: i32) -> (i32, i32) {
    %c0_i32 = arith.constant 0 : i32
    %c0_i32_0 = arith.constant 0 : i32
    %c0_i32_1 = arith.constant 0 : i32
    return %c0_i32, %c0_i32_0 : i32, i32
  }
  func.func @transform_8(%arg0: i32) -> (i32, i32) {
    %c0_i32 = arith.constant 0 : i32
    %c0_i32_0 = arith.constant 0 : i32
    %c0_i32_1 = arith.constant 0 : i32
    return %c0_i32, %c0_i32_0 : i32, i32
  }
  func.func @transform_9(%arg0: i32) -> (i32, i32) {
    %c0_i32 = arith.constant 0 : i32
    %c0_i32_0 = arith.constant 0 : i32
    return %arg0, %c0_i32 : i32, i32
  }
}

</mosaic_0001>

<bundles_post_ra>
// kernel: tpu_custom_call.1
= control target key start
LH: loop header
LB: loop body
LE: loop exit
PB: predicated region body
PF: predicated region fallthrough
CT: control target
= control target key end

     0   :  { %15 = vsyncpa [#allocation4], 0  ;;  %s613_s0 = inlined_call_operand.hbm [shape: f32[8,24], index: 0, kind: input, shape index: {}]   ;;  %s614_s1 = inlined_call_operand.hbm [shape: f32[8,8], index: 1, kind: input, shape index: {}]   ;;  %s615_s2 = inlined_call_operand.hbm [shape: f32[24,32], index: 2, kind: input, shape index: {}]   ;;  %s616_s3 = inlined_call_operand.hbm [shape: f32[8,32], index: 3, kind: input, shape index: {}]   ;;  %s617_s4 = inlined_call_operand.vmem [shape: f32[1,32], index: 4, kind: input, shape index: {}]   ;;  %s618_s5 = inlined_call_operand.hbm [shape: f32[32,32], index: 5, kind: input, shape index: {}]   ;;  %s619_s6 = inlined_call_operand.vmem [shape: f32[1,32], index: 6, kind: input, shape index: {}]   ;;  %s620_s7 = inlined_call_operand.vmem [shape: f32[1,32], index: 7, kind: input, shape index: {}]   ;;  %s621_s8 = inlined_call_operand.<no memory space> [shape: f32[1,1], index: 8, kind: input, shape index: {}]   ;;  %s622_s9 = inlined_call_operand.vmem [shape: f32[8,1], index: 9, kind: output, shape index: {}]  }
   0x1   :  { %16 = vsyncpa [#allocation6], 0 }
   0x2   :  { %17 = vsyncpa [#allocation9], 0  ;;  %s524_s30 = smov [#allocation5]   ;;  %s525_s11 = smov [#allocation8]  }
   0x3   :  { %s34_s10 = sshll.u32 %s524_s30, 4  ;;  %s56_s12 = sshll.u32 %s525_s11, 4  ;;  %s35_s10 = int_to_ptr.vmem [resolvable:$true] %s34_s10  ;;  %s57_s12 = int_to_ptr.vmem [resolvable:$true] %s56_s12 }
   0x4   :  { %s426_s13 = scalar_lea.vmem %s35_s10, 128  ;;  %p431_p1 = scmp.lt.s32.totalorder %s35_s10, %s35_s10 }
   0x5   :  { %p427_p0 = scmp.ne.s32.totalorder %s35_s10, %s426_s13  ;;  %p432_p2 = scmp.lt.s32.totalorder %s426_s13, %s426_s13 }
   0x7   :  { %p433_p3 = por %p432_p2, %p431_p1 }
   0x9   :  { %p434_p4 = pnand %p433_p3, %p427_p0 }
   0xb   :  { %437 = shalt.err (!%p434_p4)
}
   0xc   :  { %37 = dma.hbm_to_vmem [thread:$0]  %s614_s1, 128, %s35_s10, [#allocation6]  }
   0xd   :  { %s446_s16 = scalar_lea.vmem %s57_s12, 128  ;;  %p451_p6 = scmp.lt.s32.totalorder %s57_s12, %s57_s12 }
   0xe   :  { %p447_p5 = scmp.ne.s32.totalorder %s57_s12, %s446_s16  ;;  %p452_p7 = scmp.lt.s32.totalorder %s446_s16, %s446_s16 }
  0x10   :  { %p453_p8 = por %p452_p7, %p451_p6 }
  0x12   :  { %p454_p9 = pnand %p453_p8, %p447_p5 }
  0x14   :  { %457 = shalt.err (!%p454_p9)
}
  0x15   :  { %59 = dma.hbm_to_vmem [thread:$0]  %s616_s3, 128, %s57_s12, [#allocation9]  }
  0x16   :  { %s526_s19 = smov [#allocation3]   ;;  %s527_s21 = smov [#allocation7]  }
  0x17   :  { %s24_s20 = sshll.u32 %s526_s19, 4  ;;  %s43_s22 = sshll.u32 %s527_s21, 4  ;;  %s25_s20 = int_to_ptr.vmem [resolvable:$true] %s24_s20  ;;  %s44_s22 = int_to_ptr.vmem [resolvable:$true] %s43_s22 }
  0x18   :  { %s466_s23 = scalar_lea.vmem %s25_s20, 128  ;;  %p471_p11 = scmp.lt.s32.totalorder %s25_s20, %s25_s20 }
  0x19   :  { %p467_p10 = scmp.ne.s32.totalorder %s25_s20, %s466_s23  ;;  %p472_p12 = scmp.lt.s32.totalorder %s466_s23, %s466_s23 }
  0x1b   :  { %p473_p13 = por %p472_p12, %p471_p11 }
  0x1d   :  { %p474_p0 = pnand %p473_p13, %p467_p10 }
  0x1f   :  { %477 = shalt.err (!%p474_p0)
}
  0x20   :  { %27 = dma.hbm_to_vmem [thread:$0]  %s613_s0, 128, %s25_s20, [#allocation4]  }
  0x21   :  { %s486_s25 = scalar_lea.vmem %s44_s22, 384  ;;  %p491_p2 = scmp.lt.s32.totalorder %s44_s22, %s44_s22 }
  0x22   :  { %p487_p1 = scmp.ne.s32.totalorder %s44_s22, %s486_s25  ;;  %p492_p3 = scmp.lt.s32.totalorder %s486_s25, %s486_s25 }
  0x24   :  { %p493_p4 = por %p492_p3, %p491_p2 }
  0x26   :  { %p494_p5 = pnand %p493_p4, %p487_p1 }
  0x28   :  { %497 = shalt.err (!%p494_p5)
}
  0x29   :  { %s528_s3 = smov 128   ;;  %s529_s26 = smov 8  }
  0x2a   :  { %49 = dma.hbm_to_vmem [thread:$0]  %s615_s2, 384, %s44_s22, [#allocation6], %s528_s3, %s528_s3, %s529_s26  }
  0x2b   :  { %s530_s29 = smov [#allocation10]  }
  0x2c   :  { %s67_s30 = sshll.u32 %s530_s29, 4  ;;  %s68_s30 = int_to_ptr.vmem [resolvable:$true] %s67_s30 }
  0x2d   :  { %s506_s10 = scalar_lea.vmem %s68_s30, 512  ;;  %p511_p7 = scmp.lt.s32.totalorder %s68_s30, %s68_s30 }
  0x2e   :  { %p507_p6 = scmp.ne.s32.totalorder %s68_s30, %s506_s10  ;;  %p512_p8 = scmp.lt.s32.totalorder %s506_s10, %s506_s10 }
  0x30   :  { %p513_p9 = por %p512_p8, %p511_p7 }
  0x32   :  { %p514_p10 = pnand %p513_p9, %p507_p6 }
  0x34   :  { %517 = shalt.err (!%p514_p10)
}
  0x35   :  { %73 = dma.hbm_to_vmem [thread:$0]  %s618_s5, 512, %s68_s30, [#allocation9], %s528_s3, %s528_s3, %s529_s26  }
  0x36   :  { %518 = dma.done.wait [#allocation4], 128  }
  0x37   :  { %519 = vsyncadd [#allocation4], 4294967168 }
  0x38   :  { %520 = dma.done.wait [#allocation6], 512  }
  0x39   :  { %521 = vsyncadd [#allocation6], 4294966784 }
  0x3a   :  { %522 = dma.done.wait [#allocation9], 640  }
  0x3b   :  { %523 = vsyncadd [#allocation9], 4294966656  ;;  %v531_v0 = vmov 0.0   ;;  %vm532_vm0 = vmmov 0   ;;  %vm101_vm1 = vcmask 64512   ;;  %v100_v1 = vld [vmem:[#allocation8] sm:$0xff]  ;;  %v356_v27 = vstv %s621_s8 }
  0x3c   :  { %384 = vmatprep.subr.mxu1 %v531_v0  ;;  %386 = vmatprep.mubr.msk.f32.mxu1 %vm532_vm0, %v531_v0  ;;  %v99_v2 = vld [vmem:[#allocation5] sm:$0xff]  ;;  %v98_v3 = vld [vmem:[#allocation7 + $0x10] sm:$0xff]  ;;  %v97_v4 = vld [vmem:[#allocation7 + $0x8] sm:$0xff]  ;;  %vm175_vm2 = vcmask 195584   ;;  %vm269_vm3 = vcmask 261120   ;;  %vm358_vm4 = vcmask 7168  }
  0x3d   :  { %398 = vmatprep.subr.mxu0 %v531_v0  ;;  %406 = vmatprep.mubr.msk.f32.mxu0 %vm532_vm0, %v531_v0  ;;  %v96_v5 = vld [vmem:[#allocation7] sm:$0xff]  ;;  %v95_v6 = vld [vmem:[#allocation3] sm:$0xff]  ;;  %v261_v7 = vld [vmem:[#allocation10 + $0x18] sm:$0xff] }
  0x3e   :  { %385 = vmatpush3.msra.mxu1 %v100_v1  ;;  %399 = vmatpush3.msra.mxu0 %v261_v7  ;;  %v260_v8 = vld [vmem:[#allocation10 + $0x10] sm:$0xff]  ;;  %v259_v9 = vld [vmem:[#allocation10 + $0x8] sm:$0xff]  ;;  %v258_v10 = vld [vmem:[#allocation10] sm:$0xff] }
  0x3f   :  { %387 = vmatmul.mubr.msk.f32.vlgmr.msra.gmra.mxu1 %vm101_vm1, %v99_v2  ;;  %389 = vmatprep.subr.mxu1 %v531_v0  ;;  %v369_v14 = vld [vmem:[%s617_s4] ss:$0 sm:$0xff] }
  0x40   :  { %390 = vmatpush3.msra.mxu1 %v98_v3  ;;  %395 = vmatprep.mubr.msk.f32.mxu1 %vm532_vm0, %v531_v0  ;;  %v370_v19 = vld [vmem:[%s619_s6] ss:$0 sm:$0xff] }
  0x41   :  { %391 = vmatprep.subr.mxu1 %v531_v0  ;;  %400 = vmatprep.subr.mxu0 %v531_v0  ;;  %v372_v23 = vld [vmem:[%s620_s7] ss:$0 sm:$0xff] }
  0x42   :  { %392 = vmatpush3.msra.mxu1 %v97_v4  ;;  %401 = vmatpush3.msra.mxu0 %v260_v8 }
  0x43   :  { %393 = vmatprep.subr.mxu1 %v531_v0  ;;  %402 = vmatprep.subr.mxu0 %v531_v0 }
  0x44   :  { %394 = vmatpush3.msra.mxu1 %v96_v5  ;;  %403 = vmatpush3.msra.mxu0 %v259_v9 }
  0x45   :  { %396 = vmatmul.mubr.msk.f32.vlgmr.msra.gmra.mxu1 %vm175_vm2, %v95_v6  ;;  %404 = vmatprep.subr.mxu0 %v531_v0 }
  0x46   :  { %405 = vmatpush3.msra.mxu0 %v258_v10 }
  0xff   :  { %v171_v11 = vpop.f32.mrf.mxu1 }
 0x101   :  { %v388_v12 = vpop.f32.mrf.mxu1 }
 0x105   :  { %v245_v13 = vpop.f32.mrf.mxu1 }
 0x106   :  { %v246_v15 = vadd.f32 %v245_v13, %v171_v11 }
 0x107   :  { %v397_v16 = vpop.f32.mrf.mxu1 }
 0x108   :  { %v256_v17 = vadd.f32 %v369_v14, %v246_v15 }
 0x10a   :  { %v257_v18 = vmax.f32 %v256_v17, 0.0 }
 0x10c   :  { %407 = vmatmul.mubr.msk.f32.vlgmr.msra.gmra.mxu0 %vm269_vm3, %v257_v18 }
 0x1cc   :  { %v339_v20 = vpop.f32.mrf.mxu0 }
 0x1cd   :  { %v340_v21 = vadd.f32 %v370_v19, %v339_v20 }
 0x1ce   :  { %v408_v22 = vpop.f32.mrf.mxu0 }
 0x1cf   :  { %v343_v24 = vmax.f32 %v340_v21, 0.0 }
 0x1d1   :  { %v351_v25 = vmul.f32 %v372_v23, %v343_v24 }
 0x1d3   :  { %v352_v26 = vsel %vm269_vm3, %v351_v25, 0.0 }
 0x1d4   :  { %353 = vadd.xlane.f32.xlu0 %v352_v26 }
 0x25d   :  { %v354_v28 = vpop.xlane.xlu0 %353 }
 0x25e   :  { %v357_v29 = vadd.f32 %v356_v27, %v354_v28 }
 0x260   :  { %359 = vst.msk [vmem:[%s622_s9] sm:$0xff] %vm358_vm4, %v357_v29 }
 0x261   :  { %364 = vsyncpa [#allocation4], 1 }
 0x262   :  { %365 = vsyncpa [#allocation6], 1 }
 0x263   :  { %366 = vsyncpa [#allocation9], 1 }

</bundles_post_ra>
